<compile_context>
chip_gen: v6e
topology: v6e:2x2x1
jax: 0.10.0
libtpu: 0.0.40
codegen_flags: <defaults>
</compile_context>

<pallas_src>
import functools

import jax
import jax.numpy as jnp
from jax.experimental import pallas as pl
from jax.experimental.pallas import tpu as pltpu


def _layernorm(x, gamma, beta, eps):
    mean = jnp.mean(x, axis=-1, keepdims=True)
    var = jnp.mean((x - mean) ** 2, axis=-1, keepdims=True)
    return (x - mean) * jax.lax.rsqrt(var + eps) * gamma + beta


def _cti_kernel(fp_ref, gm_ref, sbm_ref, v_ref, wpT_ref, bias_ref, out_ref, *,
                num_heads, eps):
    """Per batch-tile body: gate = sigmoid(LN(fp) . m); out = (gate*v) @ Wp^T + b + fp."""
    fp = fp_ref[...].astype(jnp.float32)                 # (Bt, P, C) raw patch tokens
    Bt, P, C = fp.shape
    H = num_heads
    hd = C // H

    # Only the LayerNorm *statistics* are needed here; the affine LN is folded into gm/sbm
    # on the host side, so no normalized (Bt,P,C) temporary is ever materialized.
    mean = jnp.mean(fp, axis=-1, keepdims=True)          # (Bt, P, 1)   XLU lane reduce
    var = jnp.mean((fp - mean) ** 2, axis=-1, keepdims=True)
    rstd = jax.lax.rsqrt(var + eps)                      # (Bt, P, 1)   EUP

    gm = gm_ref[...].astype(jnp.float32)                 # (Bt, H, C) folded, LN-absorbed scores
    sbm = sbm_ref[...].astype(jnp.float32)               # (Bt, H, 1) per-head additive constant
    v = v_ref[...][:, 0, :].astype(jnp.float32)          # (Bt, C)    contour-token value

    # Unrolled per-head loop: one (Bt, P, hd)-sized temp per head, no (Bt, P, H, C) broadcast.
    parts = []
    for h in range(H):
        dot_h = jnp.sum(fp * gm[:, h, :][:, None, :], axis=-1, keepdims=True)   # VPU mul + reduce
        gate_h = jax.nn.sigmoid(rstd * dot_h + sbm[:, h, :][:, None, :])        # (Bt, P, 1) EUP
        parts.append(gate_h * v[:, h * hd:(h + 1) * hd][:, None, :])            # (Bt, P, hd)
    gated = parts[0] if H == 1 else jnp.concatenate(parts, axis=-1)             # (Bt, P, C)

    # Output projection: single flattened MXU matmul over all Bt*P token rows (f32 accumulate).
    proj = jnp.dot(gated.reshape(Bt * P, C).astype(wpT_ref.dtype), wpT_ref[...],
                   preferred_element_type=jnp.float32)                          # (Bt*P, C)
    out = proj.reshape(Bt, P, C) + bias_ref[0] + fp       # bias + residual on raw tokens
    out_ref[...] = out.astype(out_ref.dtype)


def _pick_block_b(B, P_pad, C):
    # Aim for >= min(8, B) pipelined grid steps (DMA/compute overlap + v7x dual-TC sharding)
    # while keeping one f32 (Bt, P, C) tile <= ~2 MiB, so the handful of live copies
    # (double-buffered in/out tiles + temps) stays well inside scoped VMEM on v5e/v6e/v7x.
    want_steps = min(8, B)
    tile_budget = 2 << 20
    best = 1
    for d in range(1, B + 1):
        if B % d == 0 and B // d >= want_steps and d * P_pad * C * 4 <= tile_budget:
            best = d
    return best


def _invariant_spec(shape):
    index_map = lambda i: (0,) * len(shape)
    try:
        # Single-buffer grid-invariant operands (weights / bias): no 2x VMEM copy.
        return pl.BlockSpec(shape, index_map, pipeline_mode=pl.Buffered(1))
    except TypeError:
        return pl.BlockSpec(shape, index_map)


def contour_token_inference(fea, params, *, num_heads=1, qk_scale=None,
                            block_b=None, matmul_dtype=jnp.bfloat16,
                            vmem_limit_bytes=None):
    B, N, C = fea.shape
    P = N - 2
    H = num_heads
    assert C % H == 0
    hd = C // H
    scale = qk_scale if qk_scale is not None else hd ** (-0.5)
    gamma, beta, wq, wk, wv, wp, bp = params
    eps = 1e-5
    f32 = jnp.float32

    # ---------------- host/XLA-side preprocessing (tiny contour-token path, hoisted) -------------
    g = gamma[0].astype(f32)
    b = beta[0].astype(f32)
    ct = fea[:, -1, :].astype(f32)                                  # (B, C) contour token
    cn = _layernorm(ct, g, b, eps)                                  # LN of the contour token
    k = (cn @ wk.T.astype(f32)).reshape(B, H, hd)                   # (B, H, hd)
    v = (cn @ wv.T.astype(f32)).reshape(B, 1, C)                    # (B, 1, C) value
    # Fold the Q projection into the single contour-token key (kept in f32 for accuracy):
    #   m[b,h,c] = scale * sum_d k[b,h,d] * Wq[h*hd+d, c]
    m = scale * jnp.einsum('bhd,hdc->bhc', k, wq.astype(f32).reshape(H, hd, C))
    # Fold the patch-token LayerNorm affine into the score vector:
    gm = g * m                                                      # gamma * m
    gm2 = gm - jnp.mean(gm, axis=-1, keepdims=True)                 # absorbs -rstd*mean*sum(gamma*m)
    sbm = jnp.sum(b * m, axis=-1, keepdims=True)                    # (B, H, 1) = sum(beta*m)

    wpT = wp.T.astype(matmul_dtype)                                 # only MXU operand downcast
    bias = bp.astype(f32).reshape(1, C)

    # ---------------- launch configuration --------------------------------------------------------
    P_pad = -(-P // 8) * 8                                          # sublane-align the token axis
    # TODO(synk): for production shapes also keep C a multiple of 128 (true for C=384) so stores
    # stay lane-dense; the tiny demo C=32 intentionally exercises the masked-layout path.
    f_patch = fea[:, 1:-1, :]
    if P_pad != P:
        f_patch = jnp.pad(f_patch, ((0, 0), (0, P_pad - P), (0, 0)))

    if block_b is None:
        block_b = _pick_block_b(B, P_pad, C)
    assert B % block_b == 0
    grid = (B // block_b,)

    compiler_kwargs = dict(dimension_semantics=("parallel",))       # batch tiles -> v7x TCs
    if vmem_limit_bytes is not None:
        compiler_kwargs["vmem_limit_bytes"] = vmem_limit_bytes

    kernel = functools.partial(_cti_kernel, num_heads=H, eps=eps)
    out = pl.pallas_call(
        kernel,
        out_shape=jax.ShapeDtypeStruct((B, P_pad, C), fea.dtype),
        grid=grid,
        in_specs=[
            pl.BlockSpec((block_b, P_pad, C), lambda i: (i, 0, 0)),  # raw patch tokens
            pl.BlockSpec((block_b, H, C), lambda i: (i, 0, 0)),      # folded LN-absorbed scores
            pl.BlockSpec((block_b, H, 1), lambda i: (i, 0, 0)),      # per-head constants
            pl.BlockSpec((block_b, 1, C), lambda i: (i, 0, 0)),      # contour-token value
            _invariant_spec((C, C)),                                 # Wp^T (single-buffered)
            _invariant_spec((1, C)),                                 # proj bias (single-buffered)
        ],
        out_specs=pl.BlockSpec((block_b, P_pad, C), lambda i: (i, 0, 0)),
        compiler_params=pltpu.CompilerParams(**compiler_kwargs),
    )(f_patch, gm2, sbm, v, wpT, bias)
    return out[:, :P, :]


def _reference(fea, params, num_heads=1):
    gamma, beta, wq, wk, wv, wp, bp = params
    B, N, C = fea.shape
    hd = C // num_heads
    scale = hd ** (-0.5)
    mean = fea.mean(-1, keepdims=True)
    var = ((fea - mean) ** 2).mean(-1, keepdims=True)
    x = (fea - mean) / jnp.sqrt(var + 1e-5) * gamma[0] + beta[0]
    T_s, F_s = x[:, -1:, :], x[:, 1:-1, :]
    q = (F_s @ wq.T).reshape(B, N - 2, num_heads, hd).transpose(0, 2, 1, 3)
    k = (T_s @ wk.T).reshape(B, 1, num_heads, hd).transpose(0, 2, 1, 3)
    v = (T_s @ wv.T).reshape(B, 1, num_heads, hd).transpose(0, 2, 1, 3)
    attn = jax.nn.sigmoid((q @ jnp.swapaxes(k, -2, -1)) * scale)
    out = (attn @ v).transpose(0, 2, 1, 3).reshape(B, N - 2, C)
    out = out @ wp.T + bp[0]
    return out + fea[:, 1:-1, :]


def _make_case(B, N, C, key):
    ks = jax.random.split(key, 8)
    fea = jax.random.normal(ks[0], (B, N, C), dtype=jnp.float32)
    gamma = 1.0 + 0.1 * jax.random.normal(ks[1], (1, C), dtype=jnp.float32)
    beta = 0.1 * jax.random.normal(ks[2], (1, C), dtype=jnp.float32)
    wq = 0.02 * jax.random.normal(ks[3], (C, C), dtype=jnp.float32)
    wk = 0.02 * jax.random.normal(ks[4], (C, C), dtype=jnp.float32)
    wv = 0.02 * jax.random.normal(ks[5], (C, C), dtype=jnp.float32)
    wp = 0.02 * jax.random.normal(ks[6], (C, C), dtype=jnp.float32)
    bp = 0.02 * jax.random.normal(ks[7], (1, C), dtype=jnp.float32)
    return fea, (gamma, beta, wq, wk, wv, wp, bp)


if __name__ == "__main__":
    key = jax.random.PRNGKey(0)
    key1, key2 = jax.random.split(key, 2)

    # Case 1: single head, f32 matmul operands (tight tolerance), B=4 -> 4 pipelined grid steps.
    fea, params = _make_case(4, 10, 32, key1)
    out = jax.block_until_ready(
        contour_token_inference(fea, params, num_heads=1, matmul_dtype=jnp.float32))
    ref = _reference(fea, params, num_heads=1)
    assert out.shape == ref.shape
    assert jnp.allclose(out, ref, atol=1e-4, rtol=1e-4)

    # Case 2: multi-head path (H=2) + non-multiple-of-8 token count (P=7, padded to 8 in wrapper).
    fea2, params2 = _make_case(4, 9, 32, key2)
    out2 = jax.block_until_ready(
        contour_token_inference(fea2, params2, num_heads=2, matmul_dtype=jnp.float32))
    ref2 = _reference(fea2, params2, num_heads=2)
    assert out2.shape == ref2.shape
    assert jnp.allclose(out2, ref2, atol=1e-4, rtol=1e-4)

    # Case 3: production default (bf16 MXU operands, f32 accumulate) — looser tolerance.
    out3 = jax.block_until_ready(contour_token_inference(fea, params, num_heads=1))
    assert jnp.allclose(out3, ref, atol=2e-2, rtol=2e-2)

    print("KERNEL_OK")
</pallas_src>

<mosaic_0001>
module attributes {stable_mosaic.version = 11 : i64} {
  func.func @_cti_kernel(%arg0: i32, %arg1: memref<1x8x32xf32, #tpu.memory_space<vmem>>, %arg2: memref<1x1x32xf32, #tpu.memory_space<vmem>>, %arg3: memref<1x1x1xf32, #tpu.memory_space<vmem>>, %arg4: memref<1x1x32xf32, #tpu.memory_space<vmem>>, %arg5: memref<32x32xf32, #tpu.memory_space<vmem>>, %arg6: memref<1x32xf32, #tpu.memory_space<vmem>>, %arg7: memref<1x8x32xf32, #tpu.memory_space<vmem>>) attributes {dimension_semantics = [#tpu.dimension_semantics<parallel>], iteration_bounds = array<i64: 4>, scalar_prefetch = 0 : i64, scratch_operands = 0 : i64, tpu.core_type = #tpu.core_type<tc>, window_params = [{transform_indices = @transform_0, window_bounds = array<i64: 1, 8, 32>}, {transform_indices = @transform_1, window_bounds = array<i64: 1, 1, 32>}, {transform_indices = @transform_2, window_bounds = array<i64: 1, 1, 1>}, {transform_indices = @transform_3, window_bounds = array<i64: 1, 1, 32>}, {pipeline_mode = #tpu.pipeline_mode<synchronous>, transform_indices = @transform_4, window_bounds = array<i64: 32, 32>}, {pipeline_mode = #tpu.pipeline_mode<synchronous>, transform_indices = @transform_5, window_bounds = array<i64: 1, 32>}, {transform_indices = @transform_6, window_bounds = array<i64: 1, 8, 32>}]} {
    %c0 = arith.constant 0 : index
    %c0_0 = arith.constant 0 : index
    %c0_1 = arith.constant 0 : index
    %0 = vector.load %arg1[%c0, %c0_0, %c0_1] : memref<1x8x32xf32, #tpu.memory_space<vmem>>, vector<1x8x32xf32>
    %cst = arith.constant dense<0.000000e+00> : vector<1x8xf32>
    %1 = vector.multi_reduction <add>, %0, %cst [2] : vector<1x8x32xf32> to vector<1x8xf32>
    %2 = vector.shape_cast %1 : vector<1x8xf32> to vector<1x8x1xf32>
    %cst_2 = arith.constant 3.200000e+01 : f32
    %3 = vector.broadcast %cst_2 : f32 to vector<1x8x1xf32>
    %4 = arith.divf %2, %3 : vector<1x8x1xf32>
    %5 = vector.broadcast %4 : vector<1x8x1xf32> to vector<1x8x32xf32>
    %6 = arith.subf %0, %5 : vector<1x8x32xf32>
    %7 = arith.mulf %6, %6 : vector<1x8x32xf32>
    %cst_3 = arith.constant dense<0.000000e+00> : vector<1x8xf32>
    %8 = vector.multi_reduction <add>, %7, %cst_3 [2] : vector<1x8x32xf32> to vector<1x8xf32>
    %9 = vector.shape_cast %8 : vector<1x8xf32> to vector<1x8x1xf32>
    %cst_4 = arith.constant 3.200000e+01 : f32
    %10 = vector.broadcast %cst_4 : f32 to vector<1x8x1xf32>
    %11 = arith.divf %9, %10 : vector<1x8x1xf32>
    %cst_5 = arith.constant 9.99999974E-6 : f32
    %12 = vector.broadcast %cst_5 : f32 to vector<1x8x1xf32>
    %13 = arith.addf %11, %12 : vector<1x8x1xf32>
    %14 = math.rsqrt %13 : vector<1x8x1xf32>
    %c0_6 = arith.constant 0 : index
    %c0_7 = arith.constant 0 : index
    %c0_8 = arith.constant 0 : index
    %15 = vector.load %arg2[%c0_6, %c0_7, %c0_8] : memref<1x1x32xf32, #tpu.memory_space<vmem>>, vector<1x1x32xf32>
    %c0_9 = arith.constant 0 : index
    %c0_10 = arith.constant 0 : index
    %c0_11 = arith.constant 0 : index
    %16 = vector.load %arg3[%c0_9, %c0_10, %c0_11] : memref<1x1x1xf32, #tpu.memory_space<vmem>>, vector<1x1x1xf32>
    %c0_12 = arith.constant 0 : index
    %c0_13 = arith.constant 0 : index
    %c0_14 = arith.constant 0 : index
    %17 = vector.load %arg4[%c0_12, %c0_13, %c0_14] : memref<1x1x32xf32, #tpu.memory_space<vmem>>, vector<1x1x32xf32>
    %18 = vector.shape_cast %17 : vector<1x1x32xf32> to vector<1x32xf32>
    %19 = vector.shape_cast %15 : vector<1x1x32xf32> to vector<1x32xf32>
    %20 = vector.shape_cast %19 : vector<1x32xf32> to vector<1x1x32xf32>
    %21 = vector.broadcast %20 : vector<1x1x32xf32> to vector<1x8x32xf32>
    %22 = arith.mulf %0, %21 : vector<1x8x32xf32>
    %cst_15 = arith.constant dense<0.000000e+00> : vector<1x8xf32>
    %23 = vector.multi_reduction <add>, %22, %cst_15 [2] : vector<1x8x32xf32> to vector<1x8xf32>
    %24 = vector.shape_cast %23 : vector<1x8xf32> to vector<1x8x1xf32>
    %25 = arith.mulf %14, %24 : vector<1x8x1xf32>
    %26 = vector.shape_cast %16 : vector<1x1x1xf32> to vector<1x1xf32>
    %27 = vector.shape_cast %26 : vector<1x1xf32> to vector<1x1x1xf32>
    %28 = vector.broadcast %27 : vector<1x1x1xf32> to vector<1x8x1xf32>
    %29 = arith.addf %25, %28 : vector<1x8x1xf32>
    %30 = arith.negf %29 : vector<1x8x1xf32>
    %31 = math.exp %30 : vector<1x8x1xf32>
    %cst_16 = arith.constant 1.000000e+00 : f32
    %32 = vector.broadcast %cst_16 : f32 to vector<1x8x1xf32>
    %33 = arith.addf %32, %31 : vector<1x8x1xf32>
    %34 = arith.divf %32, %33 : vector<1x8x1xf32>
    %35 = vector.shape_cast %18 : vector<1x32xf32> to vector<1x1x32xf32>
    %36 = vector.broadcast %34 : vector<1x8x1xf32> to vector<1x8x32xf32>
    %37 = vector.broadcast %35 : vector<1x1x32xf32> to vector<1x8x32xf32>
    %38 = arith.mulf %36, %37 : vector<1x8x32xf32>
    %39 = vector.shape_cast %38 : vector<1x8x32xf32> to vector<8x32xf32>
    %c0_17 = arith.constant 0 : index
    %c0_18 = arith.constant 0 : index
    %40 = vector.load %arg5[%c0_17, %c0_18] : memref<32x32xf32, #tpu.memory_space<vmem>>, vector<32x32xf32>
    %cst_19 = arith.constant dense<0.000000e+00> : vector<8x32xf32>
    %41 = tpu.matmul %39, %40, %cst_19 {dimension_numbers = #tpu.dot_dimension_numbers<[1], [0], [0], [1], [0, 0, 1, 1], [], []>} : vector<8x32xf32>, vector<32x32xf32>, vector<8x32xf32> -> vector<8x32xf32>
    %42 = vector.shape_cast %41 : vector<8x32xf32> to vector<1x8x32xf32>
    %c0_20 = arith.constant 0 : index
    %c0_21 = arith.constant 0 : index
    %43 = vector.load %arg6[%c0_20, %c0_21] : memref<1x32xf32, #tpu.memory_space<vmem>>, vector<1x32xf32>
    %44 = vector.shape_cast %43 : vector<1x32xf32> to vector<32xf32>
    %45 = vector.shape_cast %44 : vector<32xf32> to vector<1x1x32xf32>
    %46 = vector.broadcast %45 : vector<1x1x32xf32> to vector<1x8x32xf32>
    %47 = arith.addf %42, %46 : vector<1x8x32xf32>
    %48 = arith.addf %47, %0 : vector<1x8x32xf32>
    %c0_22 = arith.constant 0 : index
    %c0_23 = arith.constant 0 : index
    %c0_24 = arith.constant 0 : index
    %49 = vector.load %arg7[%c0_22, %c0_23, %c0_24] : memref<1x8x32xf32, #tpu.memory_space<vmem>>, vector<1x8x32xf32>
    tpu.vector_store %arg7[%c0_22, %c0_23, %c0_24], %48 {strides = array<i32>} : memref<1x8x32xf32, #tpu.memory_space<vmem>>, vector<1x8x32xf32>,
    return
  }
  func.func @transform_0(%arg0: i32) -> (i32, i32, i32) {
    %c0_i32 = arith.constant 0 : i32
    %c0_i32_0 = arith.constant 0 : i32
    %c0_i32_1 = arith.constant 0 : i32
    return %arg0, %c0_i32, %c0_i32_0 : i32, i32, i32
  }
  func.func @transform_1(%arg0: i32) -> (i32, i32, i32) {
    %c0_i32 = arith.constant 0 : i32
    %c0_i32_0 = arith.constant 0 : i32
    %c0_i32_1 = arith.constant 0 : i32
    return %arg0, %c0_i32, %c0_i32_0 : i32, i32, i32
  }
  func.func @transform_2(%arg0: i32) -> (i32, i32, i32) {
    %c0_i32 = arith.constant 0 : i32
    %c0_i32_0 = arith.constant 0 : i32
    %c0_i32_1 = arith.constant 0 : i32
    return %arg0, %c0_i32, %c0_i32_0 : i32, i32, i32
  }
  func.func @transform_3(%arg0: i32) -> (i32, i32, i32) {
    %c0_i32 = arith.constant 0 : i32
    %c0_i32_0 = arith.constant 0 : i32
    %c0_i32_1 = arith.constant 0 : i32
    return %arg0, %c0_i32, %c0_i32_0 : i32, i32, i32
  }
  func.func @transform_4(%arg0: i32) -> (i32, i32) {
    %c0_i32 = arith.constant 0 : i32
    %c0_i32_0 = arith.constant 0 : i32
    %c0_i32_1 = arith.constant 0 : i32
    return %c0_i32, %c0_i32_0 : i32, i32
  }
  func.func @transform_5(%arg0: i32) -> (i32, i32) {
    %c0_i32 = arith.constant 0 : i32
    %c0_i32_0 = arith.constant 0 : i32
    %c0_i32_1 = arith.constant 0 : i32
    return %c0_i32, %c0_i32_0 : i32, i32
  }
  func.func @transform_6(%arg0: i32) -> (i32, i32, i32) {
    %c0_i32 = arith.constant 0 : i32
    %c0_i32_0 = arith.constant 0 : i32
    %c0_i32_1 = arith.constant 0 : i32
    return %arg0, %c0_i32, %c0_i32_0 : i32, i32, i32
  }
}

</mosaic_0001>

<bundles_post_ra>
// kernel: tpu_custom_call.1
= control target key start
LH: loop header
LB: loop body
LE: loop exit
PB: predicated region body
PF: predicated region fallthrough
CT: control target
= control target key end

     0   :  { %s1045_s0 = inlined_call_operand.hbm [shape: f32[4,8,32], index: 0, kind: input, shape index: {}]   ;;  %s1046_s1 = inlined_call_operand.vmem [shape: f32[4,1,32], index: 1, kind: input, shape index: {}]   ;;  %s1047_s2 = inlined_call_operand.vmem [shape: f32[4,1,1], index: 2, kind: input, shape index: {}]   ;;  %s1048_s3 = inlined_call_operand.vmem [shape: f32[4,1,32], index: 3, kind: input, shape index: {}]   ;;  %s1049_s4 = inlined_call_operand.hbm [shape: f32[32,32], index: 4, kind: input, shape index: {}]   ;;  %s1050_s5 = inlined_call_operand.vmem [shape: f32[1,32], index: 5, kind: input, shape index: {}]   ;;  %s1051_s6 = inlined_call_operand.hbm [shape: f32[4,8,32], index: 6, kind: output, shape index: {}]  }
   0x1   :  { %1056 = sst [smem:[#allocation11_spill]] %s1049_s4 }
   0x2   :  { %11 = vsyncpa [#allocation3], 0 }
   0x3   :  { %13 = vsyncpa [#allocation3 + $0x1], 0 }
   0x4   :  { %14 = vsyncpa [#allocation6], 0 }
   0x5   :  { %15 = vsyncpa [#allocation4], 0 }
   0x6   :  { %17 = vsyncpa [#allocation4 + $0x1], 0  ;;  %s859_s21 = smov 0   ;;  %s861_s22 = smov 0  }
   0x7   :  { %s863_s23 = smov 0   ;;  %s865_s24 = smov 0  }
   0x8 LB: > { %s880_s25 = sadd.s32 4294967295, %s814_s24   ;;  %s586_s26 = sadd.s32 4294967294, %s814_s24   ;;  %s814_s24 = sphi %s865_s24, %s1074_s24   ;;  %s810_s23 = sphi %s863_s23, %s1073_s23   ;;  %s806_s22 = sphi %s861_s22, %s1072_s22   ;;  %s802_s21 = sphi %s859_s21, %s1071_s21  }
   0x9   : > { %p43_p0 = scmp.ne.s32.totalorder %s806_s22, %s802_s21  ;;  %p1052_p1 = scmp.eq.s32.totalorder %s880_s25, 0 }
   0xa   : > { %p193_p3 = scmp.eq.s32.totalorder %s586_s26, 3  ;;  %p587_p5 = scmp.ge.s32.totalorder %s814_s24, 1 }
   0xb   : > { %p889_p4 = por %p1052_p1, %p43_p0  ;;  %p200_p7 = scmp.lt.s32.totalorder %s814_s24, 5 }
   0xc   : > { %p894_p6 = por %p193_p3, %p43_p0  ;;  %s816_s30 = smov [#allocation5]  }
   0xd   : > { %s1057_s27 = scalar_select %p889_p4, 1, 0 }
   0xe   : > { %s1058_s28 = scalar_select %p894_p6, 1, 0 }
   0xf   : > { %p899_p8 = pnand %p587_p5, %p200_p7  ;;  %s212_s7 = sshll.u32 %s816_s30, 4  ;;  %s213_s7 = int_to_ptr.vmem [resolvable:$true] %s212_s7 }
  0x10   : > { %s912_s9 = sadd.s32 1, %s814_s24   ;;  %s30_s10 = sadd.s32 1, %s810_s23 }
  0x11   : > { %s1059_s29 = scalar_select %p899_p8, 1, 0 }
  0x12   : > { %p630_p9 = pneg %p899_p8  ;;  %s27_s11 = ssub.s32 %s814_s24, %s912_s9 }
  0x13   : > { %s703_s12 = scalar_lea.vmem %s213_s7, 512  ;;  %p711_p3 = scmp.lt.s32.totalorder %s213_s7, %s213_s7 }
  0x14   : > { %p907_p10 = pnand %p630_p9, %p1052_p1  ;;  %p704_p12 = scmp.ne.s32.totalorder %s213_s7, %s703_s12 }
  0x15   : > { %p712_p5 = scmp.lt.s32.totalorder %s703_s12, %s703_s12 }
  0x16   : > { %p694_p11 = pneg %p907_p10 }
  0x17   : > { %p713_p7 = por %p712_p5, %p711_p3 }
  0x18   : > { %p706_p13 = pnand %p704_p12, %p694_p11 }
  0x1a   : > { %p707_p0 = pneg %p706_p13 }
  0x1c   : > { %p714_p2 = pnand %p713_p7, %p707_p0 }
  0x1e   : > { %717 = shalt.err (!%p714_p2)
}
  0x1f   : > { %s817_s13 = smov 128   ;;  %s818_s14 = smov 8  }
  0x20   : > { %s1061_s4 = sld [smem:[#allocation11_spill]]  ;;  %p28_p9 = scmp.eq.s32.totalorder %s27_s11, 0 }
  0x21   : > { %p37_p11 = scmp.ne.s32.totalorder %s810_s23, %s806_s22  ;;  %p38_p12 = scmp.eq.s32.totalorder %s814_s24, 0 }
  0x22   : > { %p643_p2 = scmp.lt.s32.totalorder %s814_s24, 4  ;;  %p1062_p0 = scmp.eq.s32.totalorder %s880_s25, 3 }
  0x23   : > { %s929_s17 = scalar_select %p28_p9, %s810_s23, %s30_s10  }
  0x24   : > { %p39_p13 = por %p38_p12, %p37_p11  ;;  %p933_p3 = por %p1062_p0, %p37_p11 }
  0x25   : > { %s229_s19 = sand.u32 1, %s810_s23   ;;  %s591_s20 = sshll.u32 %s814_s24, 7 }
  0x26   : > { %633 = dma.hbm_to_vmem [thread:$0]  (!%p907_p10), %s1061_s4, 512, %s213_s7, [#allocation6], %s817_s13, %s817_s13, %s818_s14  }
  0x27   : > { %s1063_s18 = scalar_select %p933_p3, 1, 0 }
  0x28   : > { %s590_s26 = sshll.u32 %s229_s19, 3  ;;  %s942_s12 = scalar_lea.hbm %s1045_s0, %s591_s20 }
  0x29   : > { %s233_s7 = scalar_lea.vmem [#allocation2], %s590_s26  ;;  %p944_p10 = pnand %p643_p2, %p39_p13 }
  0x2a   : > { %s240_s10 = sshll.u32 %s233_s7, 4  ;;  %s230_s13 = scalar_lea.sflag [#allocation3], %s229_s19  ;;  %s241_s10 = int_to_ptr.vmem [resolvable:$true] %s240_s10 }
  0x2b   : > { %s718_s14 = scalar_lea.hbm %s942_s12, 128  ;;  %p720_p7 = pneg %p944_p10 }
  0x2c   : > { %p719_p5 = scmp.ne.s32.totalorder %s942_s12, %s718_s14  ;;  %s723_s20 = scalar_lea.hbm %s1045_s0, 512 }
  0x2d   : > { %p724_p12 = scmp.lt.s32.totalorder %s942_s12, %s1045_s0  ;;  %p725_p2 = scmp.lt.s32.totalorder %s723_s20, %s718_s14 }
  0x2e   : > { %p721_p9 = pnand %p720_p7, %p719_p5 }
  0x2f   : > { %p726_p13 = por %p725_p2, %p724_p12 }
  0x30   : > { %p722_p11 = pneg %p721_p9 }
  0x32   : > { %p727_p0 = pnand %p726_p13, %p722_p11 }
  0x34   : > { %730 = shalt.err (!%p727_p0)
}
  0x35   : > { %s731_s8 = scalar_lea.vmem %s241_s10, 128  ;;  %s819_s19 = smov [#allocation2]  }
  0x36   : > { %p732_p1 = scmp.ne.s32.totalorder %s241_s10, %s731_s8  ;;  %s736_s7 = sshll.u32 %s819_s19, 4  ;;  %s737_s7 = int_to_ptr.vmem [resolvable:$false] %s736_s7 }
  0x37   : > { %s738_s4 = scalar_lea.vmem %s737_s7, 256  ;;  %p739_p5 = scmp.lt.s32.totalorder %s241_s10, %s737_s7 }
  0x38   : > { %p734_p6 = pnand %p732_p1, %p720_p7  ;;  %p740_p9 = scmp.lt.s32.totalorder %s738_s4, %s731_s8 }
  0x3a   : > { %p735_p3 = pneg %p734_p6  ;;  %p741_p4 = por %p740_p9, %p739_p5 }
  0x3c   : > { %p742_p8 = pnand %p741_p4, %p735_p3 }
  0x3e   : > { %745 = shalt.err (!%p742_p8)
}
  0x3f   : > { %637 = dma.hbm_to_vmem [thread:$0]  (!%p944_p10), %s942_s12, 128, %s241_s10, %s230_s13  }
  0x40   : > { %p1065_p11 = scmp.ne.s32.totalorder %s1059_s29, 0 }
  0x41   : > { %s965_s14 = sand.u32 (!%p1065_p11), 1, %s806_s22   ;;  %p1066_p1 = scmp.ne.s32.totalorder (!%p1065_p11), %s1057_s27, 0 }
  0x42   : > { %267 = sbr.rel (%p1065_p11) target bundleno = 750 (0x2ee), region = 44  ;;  %s593_s15 = sshll.u32 (!%p1065_p11), %s965_s14, 3 }
  0x43   : > { %s270_s16 = scalar_lea.sflag (!%p1065_p11), [#allocation3], %s965_s14  ;;  %s273_s4 = scalar_lea.vmem (!%p1065_p11), [#allocation2], %s593_s15 }
  0x47   : > { %789 = dma.done.wait (%p1066_p1), %s270_s16, 128  }
  0x48   : > { %791 = vsyncadd (%p1066_p1), %s270_s16, 4294967168  ;;  %p1067_p4 = scmp.eq.s32.totalorder %s880_s25, 0 }
  0x4a   : > { %793 = dma.done.wait (%p1067_p4), [#allocation6], 512   ;;  %p1068_p6 = pmov %p1067_p4 }
  0x4b   : > { %vm325_vm0 = vcmask 261120   ;;  %v979_v0 = vld [vmem:[%s273_s4] sm:$0xff]  ;;  %p315_p8 = scmp.lt.s32.totalorder %s880_s25, 3  ;;  %v820_v10 = vmov 0   ;;  %v821_v12 = vmov 0.0   ;;  %v379_v14 = vld [vmem:[#allocation5 + $0x8] sm:$0xff] }
  0x4c   : > { %795 = vsyncadd (%p1068_p6), [#allocation6], 4294966784  ;;  %v326_v1 = vsel %vm325_vm0, %v979_v0, 0.0  ;;  %684 = vset.pattern.permute.xlu1 %v820_v10  ;;  %685 = vset.pattern.permute.xlu0 %v820_v10  ;;  %v381_v11 = vld [vmem:[#allocation5 + $0x18] sm:$0xff]  ;;  %v380_v13 = vld [vmem:[#allocation5 + $0x10] sm:$0xff]  ;;  %vm822_vm1 = vmmov 0  }
  0x4d   : > { %327 = vadd.xlane.f32.xlu0 %v326_v1  ;;  %s985_s29 = scalar_select %p315_p8, %s880_s25, 3  ;;  %611 = vmatprep.subr.mxu0 %v821_v12  ;;  %v378_v26 = vld [vmem:[#allocation5] sm:$0xff]  ;;  %v601_v31 = vld [vmem:[%s1050_s5] ss:$0 sm:$0xff] }
  0x4e   : > { %612 = vmatpush3.msra.mxu0 %v381_v11  ;;  %619 = vmatprep.mubr.msk.f32.mxu0 %vm822_vm1, %v821_v12  ;;  %s603_s16 = sshll.u32 %s880_s25, 7  ;;  %s314_s4 = scalar_lea.vmem [#allocation7], %s593_s15 }
  0x4f   : > { %s317_s10 = scalar_lea.vmem %s1046_s1, %s985_s29  ;;  %613 = vmatprep.subr.mxu0 %v821_v12  ;;  %s320_s20 = scalar_lea.vmem %s1047_s2, %s985_s29 }
  0x50   : > { %v596_v2 = vld [vmem:[%s317_s10] ss:$0 sm:$0xff]  ;;  %614 = vmatpush3.msra.mxu0 %v380_v13  ;;  %s323_s8 = scalar_lea.vmem %s1048_s3, %s985_s29  ;;  %s479_s27 = sshll.u32 %s314_s4, 4  ;;  %s480_s27 = int_to_ptr.vmem [resolvable:$true] %s479_s27 }
  0x51   : > { %v348_v3 = vmul.f32 %v596_v2, %v979_v0  ;;  %615 = vmatprep.subr.mxu0 %v821_v12  ;;  %v597_v20 = vld [vmem:[%s320_s20] ss:$0 sm:$0xff]  ;;  %s477_s10 = scalar_lea.hbm %s1051_s6, %s603_s16  ;;  %s466_s11 = scalar_lea.sflag [#allocation4], %s965_s14 }
  0x52   : > { %616 = vmatpush3.msra.mxu0 %v379_v14  ;;  %v599_v28 = vld [vmem:[%s323_s8] ss:$0 sm:$0xff]  ;;  %s746_s13 = scalar_lea.vmem %s480_s27, 128  ;;  %p1069_p10 = scmp.ne.s32.totalorder %s1063_s18, 0 }
  0x53   : > { %v349_v4 = vsel %vm325_vm0, %v348_v3, 0.0  ;;  %617 = vmatprep.subr.mxu0 %v821_v12  ;;  %p747_p3 = scmp.ne.s32.totalorder %s480_s27, %s746_s13  ;;  %s823_s25 = smov [#allocation7]  }
  0x54   : > { %350 = vadd.xlane.f32.xlu1 %v349_v4  ;;  %618 = vmatpush3.msra.mxu0 %v378_v26  ;;  %s750_s15 = sshll.u32 %s823_s25, 4  ;;  %s751_s15 = int_to_ptr.vmem [resolvable:$false] %s750_s15 }
  0x55   : > { %p748_p7 = pnand %p747_p3, %p1069_p10  ;;  %s752_s20 = scalar_lea.vmem %s751_s15, 256 }
  0x56   : > { %p753_p2 = scmp.lt.s32.totalorder %s480_s27, %s751_s15  ;;  %p754_p13 = scmp.lt.s32.totalorder %s752_s20, %s746_s13 }
  0x57   : > { %p749_p12 = pneg %p748_p7 }
  0x58   : > { %p755_p0 = por %p754_p13, %p753_p2 }
  0x5a   : > { %p756_p5 = pnand %p755_p0, %p749_p12 }
  0xd6   : > { %v328_v5 = vpop.xlane.xlu0 %327 }
  0xd7   : > { %v330_v6 = vmul.f32 0.03125, %v328_v5 }
  0xd9   : > { %v331_v7 = vsub.f32 %v979_v0, %v330_v6 }
  0xdb   : > { %v332_v8 = vmul.f32 %v331_v7, %v331_v7 }
  0xdd   : > { %v333_v9 = vsel %vm325_vm0, %v332_v8, 0.0  ;;  %v351_v18 = vpop.xlane.xlu1 %350 }
  0xde   : > { %334 = vadd.xlane.f32.xlu0 %v333_v9 }
 0x167   : > { %v335_v15 = vpop.xlane.xlu0 %334 }
 0x168   : > { %v336_v16 = vmul.f32 0.03125, %v335_v15 }
 0x16a   : > { %v337_v17 = vadd.f32 1e-05, %v336_v16 }
 0x16c   : > { %686 = vrsqrt.f32 %v337_v17 }
 0x179   : > { %v687_v19 = vpop.eup %686 }
 0x17a   : > { %v352_v21 = vmul.f32 %v687_v19, %v351_v18 }
 0x17c   : > { %v359_v22 = vadd.f32 %v597_v20, %v352_v21 }
 0x17e   : > { %v598_v23 = vmul.f32 -1.442695, %v359_v22 }
 0x180   : > { %688 = vpow2.f32 %v598_v23 }
 0x18d   : > { %v689_v24 = vpop.eup %688 }
 0x18e   : > { %v363_v25 = vadd.f32 1.0, %v689_v24 }
 0x190   : > { %690 = vrcp.f32 %v363_v25 }
 0x19d   : > { %v691_v27 = vpop.eup %690 }
 0x19e   : > { %368 = vperm.xlu1 %684, %v691_v27  }
 0x219   : > { %v369_v29 = vpop.permute.xlu1 %368 }
 0x21a   : > { %v377_v30 = vmul.f32 %v599_v28, %v369_v29 }
 0x21c   : > { %620 = vmatmul.mubr.msk.f32.vlgmr.msra.gmra.mxu0 %vm325_vm0, %v377_v30 }
 0x2dc   : > { %v451_v32 = vpop.f32.mrf.mxu0 }
 0x2dd   : > { %v462_v33 = vadd.f32 %v601_v31, %v451_v32 }
 0x2de   : > { %v621_v34 = vpop.f32.mrf.mxu0 }
 0x2df   : > { %v463_v35 = vadd.f32 %v462_v33, %v979_v0 }
 0x2e1   : > { %464 = vst.msk [vmem:[%s314_s4] sm:$0xff] %vm325_vm0, %v463_v35 }
 0x2e2   : > { %759 = shalt.err (!%p756_p5)
}
 0x2e3   : > { %s760_s30 = scalar_lea.hbm %s477_s10, 128  ;;  %s764_s8 = scalar_lea.hbm %s1051_s6, 512 }
 0x2e4   : > { %p761_p9 = scmp.ne.s32.totalorder %s477_s10, %s760_s30  ;;  %p765_p4 = scmp.lt.s32.totalorder %s477_s10, %s1051_s6 }
 0x2e5   : > { %p766_p6 = scmp.lt.s32.totalorder %s764_s8, %s760_s30 }
 0x2e6   : > { %p762_p11 = pnand %p761_p9, %p1069_p10 }
 0x2e7   : > { %p767_p8 = por %p766_p6, %p765_p4 }
 0x2e8   : > { %p763_p1 = pneg %p762_p11 }
 0x2ea   : > { %p768_p3 = pnand %p767_p8, %p763_p1 }
 0x2ec   : > { %771 = shalt.err (!%p768_p3)
}
 0x2ed   : > { %628 = dma.vmem_to_hbm [thread:$0]  (%p1069_p10), %s480_s27, 128, %s477_s10, %s466_s11  }
 0x2ee PF: > { %p645_p7 = scmp.ge.s32.totalorder %s814_s24, 2  ;;  %s491_s16 = sand.u32 1, %s802_s21  }
 0x2ef   : > { %p1070_p12 = scmp.ne.s32.totalorder %s1058_s28, 0  ;;  %s492_s4 = scalar_lea.sflag [#allocation4], %s491_s16 }
 0x2f1   : > { %p639_p2 = pnand %p645_p7, %p1070_p12 }
 0x2f3   : > { %p640_p13 = pneg %p639_p2 }
 0x2f5   : > { %797 = dma.done.wait (%p640_p13), %s492_s4, 128  }
 0x2f6   : > { %799 = vsyncadd (%p640_p13), %s492_s4, 4294967168  ;;  %p20_p0 = scmp.ge.s32.totalorder %s912_s9, 6   ;;  %s1071_s21 = smov %s806_s22 }
 0x2f7   : > { %s1072_s22 = smov %s810_s23  ;;  %s1073_s23 = smov %s929_s17 }
 0x2f8   : > { %s1074_s24 = smov %s912_s9  ;;  %22 = sbr.rel (!%p20_p0) target bundleno = 8 (0x8), region = 102 }
 0x2fd   :  { %497 = vsyncpa [#allocation3], 1 }
 0x2fe   :  { %499 = vsyncpa [#allocation3 + $0x1], 1 }
 0x2ff   :  { %500 = vsyncpa [#allocation6], 1 }
 0x300   :  { %501 = vsyncpa [#allocation4], 1 }
 0x301   :  { %503 = vsyncpa [#allocation4 + $0x1], 1 }

</bundles_post_ra>
